<compile_context>
chip_gen: v5e
topology: v5e:2x2
jax: 0.10.0
libtpu: 0.0.40
codegen_flags: <defaults>
</compile_context>

<pallas_src>
import jax
import jax.numpy as jnp
from jax.experimental import pallas as pl
from jax.experimental.pallas import tpu as pltpu

EPS = 1e-5


# ----------------------------------------------------------------------------
# Shared math.
# ----------------------------------------------------------------------------
def _bn(h, gamma, beta):
    """Training-mode BatchNorm1d over the batch axis with fused affine.

    Two-pass (h - mu)^2 variance on the already-resident tile (numerically
    safer than E[h^2] - mu^2).  h: (N, C) f32, gamma/beta: (1, C) f32.
    """
    mu = jnp.mean(h, axis=0, keepdims=True)
    d = h - mu
    var = jnp.mean(d * d, axis=0, keepdims=True)
    scale = gamma * jax.lax.rsqrt(var + EPS)      # rsqrt -> EUP (free slot)
    return d * scale + beta                       # 2 VPU ops / element


# ----------------------------------------------------------------------------
# Fully fused kernel (everything resident in VMEM, single grid step).
# ----------------------------------------------------------------------------
def _fused_kernel(x_ref, w1s_ref, w2_ref, gb1_ref, gb2_ref, o_ref):
    c_out = o_ref.shape[-1]
    gb1 = gb1_ref[...]                            # rows: [g1, be1, gs, bes]
    gb2 = gb2_ref[...]                            # rows: [g2, be2]
    # One MXU pass computes both x@w1 and x@ws (weights packed as [w1 | ws]).
    xw = jnp.dot(x_ref[...], w1s_ref[...], preferred_element_type=jnp.float32)
    h = jnp.maximum(_bn(xw[:, :c_out], gb1[0:1, :], gb1[1:2, :]), 0.0)
    s = _bn(xw[:, c_out:], gb1[2:3, :], gb1[3:4, :])
    hw = jnp.dot(h.astype(jnp.bfloat16), w2_ref[...],
                 preferred_element_type=jnp.float32)
    o = _bn(hw, gb2[0:1, :], gb2[1:2, :]) + s
    o_ref[...] = jnp.maximum(o, 0.0)


# ----------------------------------------------------------------------------
# Tiled path (large shapes).
# Stage 1: h = relu(BN1(x @ w1_tile))            (bf16, feature-tiled)
# Stage 2: K-tiled h @ w2 accumulation; at k==last apply BN2, compute the
#          shortcut x @ ws_tile + BN_s in-kernel (no HBM intermediate),
#          residual add, final ReLU.
# ----------------------------------------------------------------------------
def _stage1_kernel(x_ref, w1_ref, gb1_ref, h_ref):
    xw = jnp.dot(x_ref[...], w1_ref[...], preferred_element_type=jnp.float32)
    gb1 = gb1_ref[...]
    h = _bn(xw, gb1[0:1, :], gb1[1:2, :])
    h_ref[...] = jnp.maximum(h, 0.0).astype(h_ref.dtype)


def _stage2_kernel(x_ref, h_ref, w2_ref, ws_ref, gb1_ref, gb2_ref, o_ref, acc_ref):
    k = pl.program_id(1)

    @pl.when(k == 0)
    def _():
        acc_ref[...] = jnp.zeros_like(acc_ref)

    acc_ref[...] += jnp.dot(h_ref[...], w2_ref[...],
                            preferred_element_type=jnp.float32)

    @pl.when(k == pl.num_programs(1) - 1)
    def _():
        gb1 = gb1_ref[...]
        gb2 = gb2_ref[...]
        # Shortcut computed here so no (N, C_out) intermediate ever hits HBM;
        # x is a constant-index block (fetched once per pallas_call).
        sw = jnp.dot(x_ref[...], ws_ref[...], preferred_element_type=jnp.float32)
        s = _bn(sw, gb1[2:3, :], gb1[3:4, :])
        o = _bn(acc_ref[...], gb2[0:1, :], gb2[1:2, :]) + s
        o_ref[...] = jnp.maximum(o, 0.0)


# ----------------------------------------------------------------------------
# Parameter preparation (run ONCE at init, not per forward).
# ----------------------------------------------------------------------------
def prepare_params(p):
    """Pack [w1 | ws], cast MXU operands to bf16, pack BN affine vectors.

    The pre-BN linear biases (b1, b2, bs) are dropped: training-mode BatchNorm
    subtracts the batch mean, which cancels any constant added before it.
    """
    c_in, c_out = p["w1"].shape
    w1s = jnp.concatenate([p["w1"], p["ws"]], axis=1).astype(jnp.bfloat16)  # (C_in, 2*C_out)
    w2 = p["w2"].astype(jnp.bfloat16)                                        # (C_out, C_out)
    gb1 = jnp.concatenate([p["g1"], p["be1"], p["gs"], p["bes"]], axis=0)    # (4, C_out)
    gb2 = jnp.concatenate([p["g2"], p["be2"]], axis=0)                       # (2, C_out)
    return dict(w1s=w1s, w2=w2, gb1=gb1, gb2=gb2, c_in=c_in, c_out=c_out)


# ----------------------------------------------------------------------------
# Wrappers.
# ----------------------------------------------------------------------------
def _basic_block_fused(x_bf, params, *, vmem_limit_bytes):
    n, c_in = x_bf.shape
    c_out = params["c_out"]
    return pl.pallas_call(
        _fused_kernel,
        out_shape=jax.ShapeDtypeStruct((n, c_out), jnp.float32),
        grid=(1,),
        in_specs=[
            pl.BlockSpec((n, c_in), lambda i: (0, 0)),
            pl.BlockSpec((c_in, 2 * c_out), lambda i: (0, 0)),
            pl.BlockSpec((c_out, c_out), lambda i: (0, 0)),
            pl.BlockSpec((4, c_out), lambda i: (0, 0)),
            pl.BlockSpec((2, c_out), lambda i: (0, 0)),
        ],
        out_specs=pl.BlockSpec((n, c_out), lambda i: (0, 0)),
        compiler_params=pltpu.CompilerParams(
            dimension_semantics=("arbitrary",),
            vmem_limit_bytes=vmem_limit_bytes,
        ),
    )(x_bf, params["w1s"], params["w2"], params["gb1"], params["gb2"])


def _basic_block_tiled(x_bf, params, *, tile_c, tile_k, vmem_limit_bytes):
    n, c_in = x_bf.shape
    c_out = params["c_out"]
    tile_c = min(tile_c, c_out)
    tile_k = min(tile_k, c_out)
    assert c_out % tile_c == 0 and c_out % tile_k == 0
    assert tile_c % 128 == 0 and tile_k % 128 == 0
    nt = c_out // tile_c          # output-feature tiles (keep even on v7x -> 2 TCs)
    nk = c_out // tile_k          # stage-2 contraction tiles
    ws_off = c_out // tile_c      # block offset of ws inside the packed [w1 | ws]

    cparams1 = pltpu.CompilerParams(
        dimension_semantics=("parallel",),
        vmem_limit_bytes=vmem_limit_bytes,
    )
    # Stage 1: residual branch first half, bf16 output feeds the stage-2 MXU.
    # NOTE: constant-index blocks (x here, x in stage 2) could additionally use
    # pipeline_mode=pl.Buffered(1) to drop their second pipeline buffer if VMEM
    # gets tight on v7x; left at defaults for portability.
    h = pl.pallas_call(
        _stage1_kernel,
        out_shape=jax.ShapeDtypeStruct((n, c_out), jnp.bfloat16),
        grid=(nt,),
        in_specs=[
            pl.BlockSpec((n, c_in), lambda j: (0, 0)),          # x (full batch)
            pl.BlockSpec((c_in, tile_c), lambda j: (0, j)),     # w1 tile of [w1|ws]
            pl.BlockSpec((4, tile_c), lambda j: (0, j)),        # gamma/beta tile
        ],
        out_specs=pl.BlockSpec((n, tile_c), lambda j: (0, j)),
        compiler_params=cparams1,
    )(x_bf, params["w1s"], params["gb1"])

    cparams2 = pltpu.CompilerParams(
        dimension_semantics=("parallel", "arbitrary"),
        vmem_limit_bytes=vmem_limit_bytes,
    )
    out = pl.pallas_call(
        _stage2_kernel,
        out_shape=jax.ShapeDtypeStruct((n, c_out), jnp.float32),
        grid=(nt, nk),
        in_specs=[
            pl.BlockSpec((n, c_in), lambda j, k: (0, 0)),               # x
            pl.BlockSpec((n, tile_k), lambda j, k: (0, k)),             # h K-tile
            pl.BlockSpec((tile_k, tile_c), lambda j, k: (k, j)),        # w2 tile
            pl.BlockSpec((c_in, tile_c), lambda j, k: (0, ws_off + j)), # ws tile
            pl.BlockSpec((4, tile_c), lambda j, k: (0, j)),             # gb1 tile
            pl.BlockSpec((2, tile_c), lambda j, k: (0, j)),             # gb2 tile
        ],
        out_specs=pl.BlockSpec((n, tile_c), lambda j, k: (0, j)),
        scratch_shapes=[pltpu.VMEM((n, tile_c), jnp.float32)],
        compiler_params=cparams2,
    )(x_bf, h, params["w2"], params["w1s"], params["gb1"], params["gb2"])
    return out


def basic_block(x, params, *, tile_c=256, tile_k=256, force_tiled=False,
                vmem_limit_bytes=48 * 1024 * 1024):
    """BasicBlock forward (training-mode BatchNorm batch statistics).

    x: (N, C_in) float32; params: output of prepare_params().
    tile_c=256 fills the 256-wide v6e/v7x MXU (use 128 on v5e); the VMEM
    budget can be raised towards ~100 MiB on v5e/v6e (128 MiB physical) for
    larger tiles, but keep it <= ~48 MiB on v7x (64 MiB physical).
    """
    n, c_in = x.shape
    c_out = params["c_out"]
    assert c_in == params["c_in"]
    assert n % 8 == 0 and c_in % 128 == 0 and c_out % 128 == 0
    # BN statistics are exact because the full batch is resident in every
    # tile.  If N ever needs tiling for VMEM, BN must become a two-phase
    # sum / sum-of-squares reduction across batch tiles.

    x_bf = x.astype(jnp.bfloat16)

    # Rough VMEM footprint of the fully fused single-step kernel (operands,
    # output, live intermediates).  If it comfortably fits, fuse: one launch,
    # one grid step, and h / s never leave VMEM.
    fused_bytes = (
        n * c_in * 2                        # x (bf16)
        + c_in * 2 * c_out * 2              # [w1 | ws] (bf16)
        + c_out * c_out * 2                 # w2 (bf16)
        + 6 * c_out * 4                     # packed gammas / betas
        + n * c_out * 4                     # output (f32)
        + n * 2 * c_out * 4                 # xw (f32)
        + n * c_out * (4 + 2 + 4)           # s (f32), h (bf16), hw (f32)
    )
    if not force_tiled and fused_bytes <= vmem_limit_bytes // 2:
        return _basic_block_fused(x_bf, params, vmem_limit_bytes=vmem_limit_bytes)
    return _basic_block_tiled(x_bf, params, tile_c=tile_c, tile_k=tile_k,
                              vmem_limit_bytes=vmem_limit_bytes)


# ----------------------------------------------------------------------------
# Synthetic parameters (shapes match the PyTorch module; weights stored
# pre-transposed as (fan_in, fan_out)).  Linear biases are kept only for the
# exact f32 reference - training-mode BN cancels them, so the kernel omits them.
# ----------------------------------------------------------------------------
def init_params(key, c_in, c_out):
    ks = jax.random.split(key, 6)

    def linear(kw, kb, fan_in, fan_out):
        bound = 1.0 / jnp.sqrt(fan_in)
        w = jax.random.uniform(kw, (fan_in, fan_out), jnp.float32, -bound, bound)
        b = jax.random.uniform(kb, (1, fan_out), jnp.float32, -bound, bound)
        return w, b

    w1, b1 = linear(ks[0], ks[1], c_in, c_out)
    w2, b2 = linear(ks[2], ks[3], c_out, c_out)
    ws, bs = linear(ks[4], ks[5], c_in, c_out)

    ones = jnp.ones((1, c_out), jnp.float32)
    zeros = jnp.zeros((1, c_out), jnp.float32)
    return dict(
        w1=w1, b1=b1, g1=ones, be1=zeros,
        w2=w2, b2=b2, g2=ones, be2=zeros,
        ws=ws, bs=bs, gs=ones, bes=zeros,
    )


# ----------------------------------------------------------------------------
# References.
# ----------------------------------------------------------------------------
def _reference_f32(x, p):
    """Exact PyTorch-semantics reference (f32 matmuls, biases included)."""
    h = _bn(x @ p["w1"] + p["b1"], p["g1"], p["be1"])
    h = jnp.maximum(h, 0.0)
    h = _bn(h @ p["w2"] + p["b2"], p["g2"], p["be2"])
    s = _bn(x @ p["ws"] + p["bs"], p["gs"], p["bes"])
    return jnp.maximum(h + s, 0.0)


def _reference_bf16(x, p):
    """Reference with the same bf16 matmul-operand precision as the kernel."""
    xb = x.astype(jnp.bfloat16)
    h = jnp.dot(xb, p["w1"].astype(jnp.bfloat16), preferred_element_type=jnp.float32)
    h = jnp.maximum(_bn(h, p["g1"], p["be1"]), 0.0).astype(jnp.bfloat16)
    s = _bn(jnp.dot(xb, p["ws"].astype(jnp.bfloat16),
                    preferred_element_type=jnp.float32), p["gs"], p["bes"])
    h2 = _bn(jnp.dot(h, p["w2"].astype(jnp.bfloat16),
                     preferred_element_type=jnp.float32), p["g2"], p["be2"])
    return jnp.maximum(h2 + s, 0.0)


if __name__ == "__main__":
    key = jax.random.PRNGKey(0)
    kx, kp, kx2, kp2 = jax.random.split(key, 4)

    # --- Small demo shape -> fully fused single-launch path -----------------
    batch, in_channels, out_channels = 8, 128, 256   # in != out -> shortcut path
    x = jax.random.normal(kx, (batch, in_channels), jnp.float32)
    raw = init_params(kp, in_channels, out_channels)
    params = prepare_params(raw)                     # one-time pack/cast

    out = basic_block(x, params)
    out = jax.block_until_ready(out)
    assert out.shape == (batch, out_channels)
    assert bool(jnp.all(jnp.isfinite(out)))
    assert bool(jnp.allclose(out, _reference_bf16(x, raw), atol=2e-2, rtol=2e-2))
    assert bool(jnp.allclose(out, _reference_f32(x, raw), atol=1e-1, rtol=1e-1))

    # --- Larger shape -> exercise the feature/K-tiled two-stage path --------
    batch2, in2, out2c = 16, 256, 512
    x2 = jax.random.normal(kx2, (batch2, in2), jnp.float32)
    raw2 = init_params(kp2, in2, out2c)
    params2 = prepare_params(raw2)

    out2 = basic_block(x2, params2, force_tiled=True, tile_c=256, tile_k=256)
    out2 = jax.block_until_ready(out2)
    assert out2.shape == (batch2, out2c)
    assert bool(jnp.all(jnp.isfinite(out2)))
    assert bool(jnp.allclose(out2, _reference_bf16(x2, raw2), atol=2e-2, rtol=2e-2))
    assert bool(jnp.allclose(out2, _reference_f32(x2, raw2), atol=1e-1, rtol=1e-1))

    print("KERNEL_OK")
</pallas_src>

<mosaic_0001>
module attributes {stable_mosaic.version = 11 : i64} {
  func.func @_fused_kernel(%arg0: i32, %arg1: memref<8x128xbf16, #tpu.memory_space<vmem>>, %arg2: memref<128x512xbf16, #tpu.memory_space<vmem>>, %arg3: memref<256x256xbf16, #tpu.memory_space<vmem>>, %arg4: memref<4x256xf32, #tpu.memory_space<vmem>>, %arg5: memref<2x256xf32, #tpu.memory_space<vmem>>, %arg6: memref<8x256xf32, #tpu.memory_space<vmem>>) attributes {dimension_semantics = [#tpu.dimension_semantics<arbitrary>], iteration_bounds = array<i64: 1>, scalar_prefetch = 0 : i64, scratch_operands = 0 : i64, tpu.core_type = #tpu.core_type<tc>, window_params = [{pipeline_mode = #tpu.pipeline_mode<synchronous>, transform_indices = @transform_0, window_bounds = array<i64: 8, 128>}, {pipeline_mode = #tpu.pipeline_mode<synchronous>, transform_indices = @transform_1, window_bounds = array<i64: 128, 512>}, {pipeline_mode = #tpu.pipeline_mode<synchronous>, transform_indices = @transform_2, window_bounds = array<i64: 256, 256>}, {pipeline_mode = #tpu.pipeline_mode<synchronous>, transform_indices = @transform_3, window_bounds = array<i64: 4, 256>}, {pipeline_mode = #tpu.pipeline_mode<synchronous>, transform_indices = @transform_4, window_bounds = array<i64: 2, 256>}, {pipeline_mode = #tpu.pipeline_mode<synchronous>, transform_indices = @transform_5, window_bounds = array<i64: 8, 256>}]} {
    %c0 = arith.constant 0 : index
    %c0_0 = arith.constant 0 : index
    %0 = vector.load %arg4[%c0, %c0_0] : memref<4x256xf32, #tpu.memory_space<vmem>>, vector<4x256xf32>
    %c0_1 = arith.constant 0 : index
    %c0_2 = arith.constant 0 : index
    %1 = vector.load %arg5[%c0_1, %c0_2] : memref<2x256xf32, #tpu.memory_space<vmem>>, vector<2x256xf32>
    %c0_3 = arith.constant 0 : index
    %c0_4 = arith.constant 0 : index
    %2 = vector.load %arg1[%c0_3, %c0_4] : memref<8x128xbf16, #tpu.memory_space<vmem>>, vector<8x128xbf16>
    %c0_5 = arith.constant 0 : index
    %c0_6 = arith.constant 0 : index
    %3 = vector.load %arg2[%c0_5, %c0_6] : memref<128x512xbf16, #tpu.memory_space<vmem>>, vector<128x512xbf16>
    %cst = arith.constant dense<0.000000e+00> : vector<8x512xf32>
    %4 = tpu.matmul %2, %3, %cst {dimension_numbers = #tpu.dot_dimension_numbers<[1], [0], [0], [1], [0, 0, 1, 1], [], []>} : vector<8x128xbf16>, vector<128x512xbf16>, vector<8x512xf32> -> vector<8x512xf32>
    %5 = vector.extract_strided_slice %4 {offsets = [0, 0], sizes = [8, 256], strides = [1, 1]} : vector<8x512xf32> to vector<8x256xf32>
    %6 = vector.extract_strided_slice %0 {offsets = [0, 0], sizes = [1, 256], strides = [1, 1]} : vector<4x256xf32> to vector<1x256xf32>
    %7 = vector.extract_strided_slice %0 {offsets = [1, 0], sizes = [1, 256], strides = [1, 1]} : vector<4x256xf32> to vector<1x256xf32>
    %cst_7 = arith.constant dense<0.000000e+00> : vector<256xf32>
    %8 = vector.multi_reduction <add>, %5, %cst_7 [0] : vector<8x256xf32> to vector<256xf32>
    %9 = vector.shape_cast %8 : vector<256xf32> to vector<1x256xf32>
    %cst_8 = arith.constant 8.000000e+00 : f32
    %10 = vector.broadcast %cst_8 : f32 to vector<1x256xf32>
    %11 = arith.divf %9, %10 : vector<1x256xf32>
    %12 = vector.broadcast %11 : vector<1x256xf32> to vector<8x256xf32>
    %13 = arith.subf %5, %12 : vector<8x256xf32>
    %14 = arith.mulf %13, %13 : vector<8x256xf32>
    %cst_9 = arith.constant dense<0.000000e+00> : vector<256xf32>
    %15 = vector.multi_reduction <add>, %14, %cst_9 [0] : vector<8x256xf32> to vector<256xf32>
    %16 = vector.shape_cast %15 : vector<256xf32> to vector<1x256xf32>
    %cst_10 = arith.constant 8.000000e+00 : f32
    %17 = vector.broadcast %cst_10 : f32 to vector<1x256xf32>
    %18 = arith.divf %16, %17 : vector<1x256xf32>
    %cst_11 = arith.constant 9.99999974E-6 : f32
    %19 = vector.broadcast %cst_11 : f32 to vector<1x256xf32>
    %20 = arith.addf %18, %19 : vector<1x256xf32>
    %21 = math.rsqrt %20 : vector<1x256xf32>
    %22 = arith.mulf %6, %21 : vector<1x256xf32>
    %23 = vector.broadcast %22 : vector<1x256xf32> to vector<8x256xf32>
    %24 = arith.mulf %13, %23 : vector<8x256xf32>
    %25 = vector.broadcast %7 : vector<1x256xf32> to vector<8x256xf32>
    %26 = arith.addf %24, %25 : vector<8x256xf32>
    %cst_12 = arith.constant 0.000000e+00 : f32
    %27 = vector.broadcast %cst_12 : f32 to vector<8x256xf32>
    %28 = arith.maximumf %26, %27 : vector<8x256xf32>
    %29 = vector.extract_strided_slice %4 {offsets = [0, 256], sizes = [8, 256], strides = [1, 1]} : vector<8x512xf32> to vector<8x256xf32>
    %30 = vector.extract_strided_slice %0 {offsets = [2, 0], sizes = [1, 256], strides = [1, 1]} : vector<4x256xf32> to vector<1x256xf32>
    %31 = vector.extract_strided_slice %0 {offsets = [3, 0], sizes = [1, 256], strides = [1, 1]} : vector<4x256xf32> to vector<1x256xf32>
    %cst_13 = arith.constant dense<0.000000e+00> : vector<256xf32>
    %32 = vector.multi_reduction <add>, %29, %cst_13 [0] : vector<8x256xf32> to vector<256xf32>
    %33 = vector.shape_cast %32 : vector<256xf32> to vector<1x256xf32>
    %cst_14 = arith.constant 8.000000e+00 : f32
    %34 = vector.broadcast %cst_14 : f32 to vector<1x256xf32>
    %35 = arith.divf %33, %34 : vector<1x256xf32>
    %36 = vector.broadcast %35 : vector<1x256xf32> to vector<8x256xf32>
    %37 = arith.subf %29, %36 : vector<8x256xf32>
    %38 = arith.mulf %37, %37 : vector<8x256xf32>
    %cst_15 = arith.constant dense<0.000000e+00> : vector<256xf32>
    %39 = vector.multi_reduction <add>, %38, %cst_15 [0] : vector<8x256xf32> to vector<256xf32>
    %40 = vector.shape_cast %39 : vector<256xf32> to vector<1x256xf32>
    %cst_16 = arith.constant 8.000000e+00 : f32
    %41 = vector.broadcast %cst_16 : f32 to vector<1x256xf32>
    %42 = arith.divf %40, %41 : vector<1x256xf32>
    %cst_17 = arith.constant 9.99999974E-6 : f32
    %43 = vector.broadcast %cst_17 : f32 to vector<1x256xf32>
    %44 = arith.addf %42, %43 : vector<1x256xf32>
    %45 = math.rsqrt %44 : vector<1x256xf32>
    %46 = arith.mulf %30, %45 : vector<1x256xf32>
    %47 = vector.broadcast %46 : vector<1x256xf32> to vector<8x256xf32>
    %48 = arith.mulf %37, %47 : vector<8x256xf32>
    %49 = vector.broadcast %31 : vector<1x256xf32> to vector<8x256xf32>
    %50 = arith.addf %48, %49 : vector<8x256xf32>
    %51 = arith.truncf %28 : vector<8x256xf32> to vector<8x256xbf16>
    %c0_18 = arith.constant 0 : index
    %c0_19 = arith.constant 0 : index
    %52 = vector.load %arg3[%c0_18, %c0_19] : memref<256x256xbf16, #tpu.memory_space<vmem>>, vector<256x256xbf16>
    %cst_20 = arith.constant dense<0.000000e+00> : vector<8x256xf32>
    %53 = tpu.matmul %51, %52, %cst_20 {dimension_numbers = #tpu.dot_dimension_numbers<[1], [0], [0], [1], [0, 0, 1, 1], [], []>} : vector<8x256xbf16>, vector<256x256xbf16>, vector<8x256xf32> -> vector<8x256xf32>
    %54 = vector.extract_strided_slice %1 {offsets = [0, 0], sizes = [1, 256], strides = [1, 1]} : vector<2x256xf32> to vector<1x256xf32>
    %55 = vector.extract_strided_slice %1 {offsets = [1, 0], sizes = [1, 256], strides = [1, 1]} : vector<2x256xf32> to vector<1x256xf32>
    %cst_21 = arith.constant dense<0.000000e+00> : vector<256xf32>
    %56 = vector.multi_reduction <add>, %53, %cst_21 [0] : vector<8x256xf32> to vector<256xf32>
    %57 = vector.shape_cast %56 : vector<256xf32> to vector<1x256xf32>
    %cst_22 = arith.constant 8.000000e+00 : f32
    %58 = vector.broadcast %cst_22 : f32 to vector<1x256xf32>
    %59 = arith.divf %57, %58 : vector<1x256xf32>
    %60 = vector.broadcast %59 : vector<1x256xf32> to vector<8x256xf32>
    %61 = arith.subf %53, %60 : vector<8x256xf32>
    %62 = arith.mulf %61, %61 : vector<8x256xf32>
    %cst_23 = arith.constant dense<0.000000e+00> : vector<256xf32>
    %63 = vector.multi_reduction <add>, %62, %cst_23 [0] : vector<8x256xf32> to vector<256xf32>
    %64 = vector.shape_cast %63 : vector<256xf32> to vector<1x256xf32>
    %cst_24 = arith.constant 8.000000e+00 : f32
    %65 = vector.broadcast %cst_24 : f32 to vector<1x256xf32>
    %66 = arith.divf %64, %65 : vector<1x256xf32>
    %cst_25 = arith.constant 9.99999974E-6 : f32
    %67 = vector.broadcast %cst_25 : f32 to vector<1x256xf32>
    %68 = arith.addf %66, %67 : vector<1x256xf32>
    %69 = math.rsqrt %68 : vector<1x256xf32>
    %70 = arith.mulf %54, %69 : vector<1x256xf32>
    %71 = vector.broadcast %70 : vector<1x256xf32> to vector<8x256xf32>
    %72 = arith.mulf %61, %71 : vector<8x256xf32>
    %73 = vector.broadcast %55 : vector<1x256xf32> to vector<8x256xf32>
    %74 = arith.addf %72, %73 : vector<8x256xf32>
    %75 = arith.addf %74, %50 : vector<8x256xf32>
    %cst_26 = arith.constant 0.000000e+00 : f32
    %76 = vector.broadcast %cst_26 : f32 to vector<8x256xf32>
    %77 = arith.maximumf %75, %76 : vector<8x256xf32>
    %c0_27 = arith.constant 0 : index
    %c0_28 = arith.constant 0 : index
    %78 = vector.load %arg6[%c0_27, %c0_28] : memref<8x256xf32, #tpu.memory_space<vmem>>, vector<8x256xf32>
    tpu.vector_store %arg6[%c0_27, %c0_28], %77 {strides = array<i32>} : memref<8x256xf32, #tpu.memory_space<vmem>>, vector<8x256xf32>,
    return
  }
  func.func @transform_0(%arg0: i32) -> (i32, i32) {
    %c0_i32 = arith.constant 0 : i32
    %c0_i32_0 = arith.constant 0 : i32
    %c0_i32_1 = arith.constant 0 : i32
    return %c0_i32, %c0_i32_0 : i32, i32
  }
  func.func @transform_1(%arg0: i32) -> (i32, i32) {
    %c0_i32 = arith.constant 0 : i32
    %c0_i32_0 = arith.constant 0 : i32
    %c0_i32_1 = arith.constant 0 : i32
    return %c0_i32, %c0_i32_0 : i32, i32
  }
  func.func @transform_2(%arg0: i32) -> (i32, i32) {
    %c0_i32 = arith.constant 0 : i32
    %c0_i32_0 = arith.constant 0 : i32
    %c0_i32_1 = arith.constant 0 : i32
    return %c0_i32, %c0_i32_0 : i32, i32
  }
  func.func @transform_3(%arg0: i32) -> (i32, i32) {
    %c0_i32 = arith.constant 0 : i32
    %c0_i32_0 = arith.constant 0 : i32
    %c0_i32_1 = arith.constant 0 : i32
    return %c0_i32, %c0_i32_0 : i32, i32
  }
  func.func @transform_4(%arg0: i32) -> (i32, i32) {
    %c0_i32 = arith.constant 0 : i32
    %c0_i32_0 = arith.constant 0 : i32
    %c0_i32_1 = arith.constant 0 : i32
    return %c0_i32, %c0_i32_0 : i32, i32
  }
  func.func @transform_5(%arg0: i32) -> (i32, i32) {
    %c0_i32 = arith.constant 0 : i32
    %c0_i32_0 = arith.constant 0 : i32
    %c0_i32_1 = arith.constant 0 : i32
    return %c0_i32, %c0_i32_0 : i32, i32
  }
}

</mosaic_0001>

<bundles_post_ra>
// kernel: tpu_custom_call.1
= control target key start
LH: loop header
LB: loop body
LE: loop exit
PB: predicated region body
PF: predicated region fallthrough
CT: control target
= control target key end

     0   :  { %10 = vsyncpa [#allocation3], 0  ;;  %s1468_s0 = inlined_call_operand.hbm [shape: bf16[8,128], index: 0, kind: input, shape index: {}]   ;;  %s1469_s1 = inlined_call_operand.hbm [shape: bf16[128,512], index: 1, kind: input, shape index: {}]   ;;  %s1470_s2 = inlined_call_operand.hbm [shape: bf16[256,256], index: 2, kind: input, shape index: {}]   ;;  %s1471_s3 = inlined_call_operand.hbm [shape: f32[4,256], index: 3, kind: input, shape index: {}]   ;;  %s1472_s4 = inlined_call_operand.hbm [shape: f32[2,256], index: 4, kind: input, shape index: {}]   ;;  %s1473_s5 = inlined_call_operand.hbm [shape: f32[8,256], index: 5, kind: output, shape index: {}]  }
   0x1   :  { %11 = vsyncpa [#allocation6], 0 }
   0x2   :  { %12 = vsyncpa [#allocation9], 0  ;;  %s29_s20 = sshll.u32 %s1469_s1, 4  ;;  %s30_s20 = int_to_ptr.hbm [resolvable:$true] %s29_s20 }
   0x3   :  { %13 = vsyncpa [#allocation4], 0  ;;  %s1353_s21 = smov [#allocation5]   ;;  %s56_s25 = sshll.u32 %s1471_s3, 4  ;;  %s57_s25 = int_to_ptr.hbm [resolvable:$true] %s56_s25 }
   0x4   :  { %s31_s22 = sshll.u32 %s1353_s21, 4  ;;  %s1354_s26 = smov 256   ;;  %s32_s22 = int_to_ptr.vmem [resolvable:$true] %s31_s22 }
   0x5   :  { %s1355_s27 = smov 16   ;;  %s1356_s28 = smov [#allocation8]  }
   0x6   :  { %37 = dma.hbm_to_vmem [thread:$0]  %s30_s20, 4096, %s32_s22, [#allocation6], %s1354_s26, %s1354_s26, %s1355_s27  }
   0x7   :  { %s58_s29 = sshll.u32 %s1356_s28, 4  ;;  %s19_s7 = sshll.u32 %s1468_s0, 4  ;;  %s59_s29 = int_to_ptr.vmem [resolvable:$true] %s58_s29  ;;  %s20_s7 = int_to_ptr.hbm [resolvable:$true] %s19_s7 }
   0x8   :  { %61 = dma.hbm_to_vmem [thread:$0]  %s57_s25, 128, %s59_s29, [#allocation9]  }
   0x9   :  { %s42_s9 = sshll.u32 %s1470_s2, 4  ;;  %s1357_s10 = smov [#allocation2]   ;;  %s43_s9 = int_to_ptr.hbm [resolvable:$true] %s42_s9 }
   0xa   :  { %s21_s11 = sshll.u32 %s1357_s10, 4  ;;  %s1358_s3 = smov [#allocation7]   ;;  %s22_s11 = int_to_ptr.vmem [resolvable:$true] %s21_s11 }
   0xb   :  { %24 = dma.hbm_to_vmem [thread:$0]  %s20_s7, 64, %s22_s11, [#allocation3]  }
   0xc   :  { %s44_s12 = sshll.u32 %s1358_s3, 4  ;;  %s1359_s13 = smov 128   ;;  %s45_s12 = int_to_ptr.vmem [resolvable:$true] %s44_s12 }
   0xd   :  { %s1360_s14 = smov 8   ;;  %s67_s16 = sshll.u32 %s1472_s4, 4  ;;  %s68_s16 = int_to_ptr.hbm [resolvable:$true] %s67_s16 }
   0xe   :  { %50 = dma.hbm_to_vmem [thread:$0]  %s43_s9, 4096, %s45_s12, [#allocation6], %s1359_s13, %s1359_s13, %s1360_s14  }
   0xf   :  { %s1361_s17 = smov [#allocation10]  }
  0x10   :  { %s69_s18 = sshll.u32 %s1361_s17, 4  ;;  %s70_s18 = int_to_ptr.vmem [resolvable:$true] %s69_s18 }
  0x11   :  { %72 = dma.hbm_to_vmem [thread:$0]  %s68_s16, 64, %s70_s18, [#allocation9]  }
  0x12   :  { %1345 = dma.done.wait [#allocation3], 64  }
  0x13   :  { %1346 = vsyncadd [#allocation3], 4294967232 }
  0x14   :  { %1347 = dma.done.wait [#allocation6], 8192  }
  0x15   :  { %1348 = vsyncadd [#allocation6], 4294959104 }
  0x16   :  { %1349 = dma.done.wait [#allocation9], 192  }
  0x17   :  { %1350 = vsyncadd [#allocation9], 4294967104  ;;  %v970_v0 = vld [vmem:[#allocation5 + $0xe0] sm:$0xf]  ;;  %v1142_v1 = vld [vmem:[#allocation5 + $0xec] sm:$0xf0] }
  0x18   :  { %v1140_v2 = vld [vmem:[#allocation5 + $0xe4] sm:$0xf]  ;;  %v971_v3 = vor.u32 %v1142_v1, %v970_v0  ;;  %v972_v4 = vld [vmem:[#allocation5 + $0xf0] sm:$0xf0]  ;;  %v954_v5 = vld [vmem:[#allocation5 + $0xc0] sm:$0xf] }
  0x19   :  { %v1138_v6 = vld [vmem:[#allocation5 + $0xcc] sm:$0xf0]  ;;  %v975_v7 = vor.u32 %v1140_v2, %v972_v4  ;;  %v1136_v8 = vld [vmem:[#allocation5 + $0xc4] sm:$0xf]  ;;  %v956_v9 = vld [vmem:[#allocation5 + $0xd0] sm:$0xf0] }
  0x1a   :  { %288 = vmatpush.bf16.msra.mxu0 %v971_v3  ;;  %v955_v10 = vor.u32 %v1138_v6, %v954_v5  ;;  %v959_v11 = vor.u32 %v1136_v8, %v956_v9  ;;  %v938_v12 = vld [vmem:[#allocation5 + $0xa0] sm:$0xf]  ;;  %v1134_v13 = vld [vmem:[#allocation5 + $0xac] sm:$0xf0]  ;;  %v1132_v14 = vld [vmem:[#allocation5 + $0xa4] sm:$0xf] }
  0x1b   :  { %301 = vmatpush.bf16.msra.mxu1 %v975_v7  ;;  %v940_v15 = vld [vmem:[#allocation5 + $0xb0] sm:$0xf0]  ;;  %v939_v16 = vor.u32 %v1134_v13, %v938_v12  ;;  %v922_v18 = vld [vmem:[#allocation5 + $0x80] sm:$0xf]  ;;  %v1130_v19 = vld [vmem:[#allocation5 + $0x8c] sm:$0xf0] }
  0x1c   :  { %v943_v17 = vor.u32 %v1132_v14, %v940_v15  ;;  %v1128_v20 = vld [vmem:[#allocation5 + $0x84] sm:$0xf]  ;;  %v924_v21 = vld [vmem:[#allocation5 + $0x90] sm:$0xf0]  ;;  %v906_v22 = vld [vmem:[#allocation5 + $0x60] sm:$0xf]  ;;  %v923_v24 = vor.u32 %v1130_v19, %v922_v18 }
  0x1d   :  { %v1126_v23 = vld [vmem:[#allocation5 + $0x6c] sm:$0xf0]  ;;  %v1124_v25 = vld [vmem:[#allocation5 + $0x64] sm:$0xf]  ;;  %v1141_v26 = vld [vmem:[#allocation5 + $0xec] sm:$0xf]  ;;  %v927_v29 = vor.u32 %v1128_v20, %v924_v21 }
  0x1e   :  { %289 = vmatpush.bf16.msra.mxu0 %v955_v10  ;;  %v980_v27 = vld [vmem:[#allocation5 + $0xf8] sm:$0xf0]  ;;  %v978_v28 = vld [vmem:[#allocation5 + $0xe8] sm:$0xf]  ;;  %v1143_v31 = vld [vmem:[#allocation5 + $0xf4] sm:$0xf0]  ;;  %v907_v39 = vor.u32 %v1126_v23, %v906_v22 }
  0x1f   :  { %302 = vmatpush.bf16.msra.mxu1 %v959_v11  ;;  %v983_v30 = vor.u32 %v1141_v26, %v980_v27  ;;  %v1137_v32 = vld [vmem:[#allocation5 + $0xcc] sm:$0xf]  ;;  %v964_v33 = vld [vmem:[#allocation5 + $0xd8] sm:$0xf0]  ;;  %v908_v34 = vld [vmem:[#allocation5 + $0x70] sm:$0xf0]  ;;  %v979_v35 = vor.u32 %v1143_v31, %v978_v28 }
  0x20   :  { %v962_v36 = vld [vmem:[#allocation5 + $0xc8] sm:$0xf]  ;;  %v1139_v37 = vld [vmem:[#allocation5 + $0xd4] sm:$0xf0]  ;;  %v967_v38 = vor.u32 %v1137_v32, %v964_v33  ;;  %v890_v40 = vld [vmem:[#allocation5 + $0x40] sm:$0xf]  ;;  %v911_v44 = vor.u32 %v1124_v25, %v908_v34 }
  0x21   :  { %327 = vmatpush.bf16.msra.mxu3 %v983_v30  ;;  %314 = vmatpush.bf16.msra.mxu2 %v979_v35  ;;  %v963_v41 = vor.u32 %v1139_v37, %v962_v36  ;;  %v1133_v42 = vld [vmem:[#allocation5 + $0xac] sm:$0xf]  ;;  %v948_v43 = vld [vmem:[#allocation5 + $0xb8] sm:$0xf0]  ;;  %v1122_v45 = vld [vmem:[#allocation5 + $0x4c] sm:$0xf0] }
  0x22   :  { %290 = vmatpush.bf16.msra.mxu0 %v939_v16  ;;  %v946_v46 = vld [vmem:[#allocation5 + $0xa8] sm:$0xf]  ;;  %v1135_v47 = vld [vmem:[#allocation5 + $0xb4] sm:$0xf0]  ;;  %v1120_v48 = vld [vmem:[#allocation5 + $0x44] sm:$0xf]  ;;  %v951_v50 = vor.u32 %v1133_v42, %v948_v43  ;;  %v891_v51 = vor.u32 %v1122_v45, %v890_v40 }
  0x23   :  { %303 = vmatpush.bf16.msra.mxu1 %v943_v17  ;;  %v892_v49 = vld [vmem:[#allocation5 + $0x50] sm:$0xf0]  ;;  %v874_v52 = vld [vmem:[#allocation5 + $0x20] sm:$0xf]  ;;  %v947_v53 = vor.u32 %v1135_v47, %v946_v46  ;;  %v1129_v54 = vld [vmem:[#allocation5 + $0x8c] sm:$0xf] }
  0x24   :  { %v932_v55 = vld [vmem:[#allocation5 + $0x98] sm:$0xf0]  ;;  %v895_v56 = vor.u32 %v1120_v48, %v892_v49  ;;  %v1118_v57 = vld [vmem:[#allocation5 + $0x2c] sm:$0xf0]  ;;  %v930_v58 = vld [vmem:[#allocation5 + $0x88] sm:$0xf] }
  0x25   :  { %328 = vmatpush.bf16.msra.mxu3 %v967_v38  ;;  %315 = vmatpush.bf16.msra.mxu2 %v963_v41  ;;  %v1131_v59 = vld [vmem:[#allocation5 + $0x94] sm:$0xf0]  ;;  %v1116_v60 = vld [vmem:[#allocation5 + $0x24] sm:$0xf]  ;;  %v876_v61 = vld [vmem:[#allocation5 + $0x30] sm:$0xf0]  ;;  %v935_v62 = vor.u32 %v1129_v54, %v932_v55  ;;  %v875_v63 = vor.u32 %v1118_v57, %v874_v52 }
  0x26   :  { %291 = vmatpush.bf16.msra.mxu0 %v923_v24  ;;  %v858_v0 = vld [vmem:[#allocation5] sm:$0xf]  ;;  %v931_v1 = vor.u32 %v1131_v59, %v930_v58  ;;  %v1125_v2 = vld [vmem:[#allocation5 + $0x6c] sm:$0xf]  ;;  %v916_v3 = vld [vmem:[#allocation5 + $0x78] sm:$0xf0]  ;;  %v879_v4 = vor.u32 %v1116_v60, %v876_v61 }
  0x27   :  { %304 = vmatpush.bf16.msra.mxu1 %v927_v29  ;;  %v1114_v5 = vld [vmem:[#allocation5 + $0xc] sm:$0xf0]  ;;  %v914_v6 = vld [vmem:[#allocation5 + $0x68] sm:$0xf]  ;;  %v1127_v7 = vld [vmem:[#allocation5 + $0x74] sm:$0xf0]  ;;  %v919_v10 = vor.u32 %v1125_v2, %v916_v3 }
  0x28   :  { %v1112_v8 = vld [vmem:[#allocation5 + $0x4] sm:$0xf]  ;;  %v860_v9 = vld [vmem:[#allocation5 + $0x10] sm:$0xf0]  ;;  %v859_v11 = vor.u32 %v1114_v5, %v858_v0  ;;  %v915_v12 = vor.u32 %v1127_v7, %v914_v6  ;;  %v1121_v13 = vld [vmem:[#allocation5 + $0x4c] sm:$0xf] }
  0x29   :  { %329 = vmatpush.bf16.msra.mxu3 %v951_v50  ;;  %316 = vmatpush.bf16.msra.mxu2 %v947_v53  ;;  %v900_v14 = vld [vmem:[#allocation5 + $0x58] sm:$0xf0]  ;;  %v863_v15 = vor.u32 %v1112_v8, %v860_v9  ;;  %v898_v16 = vld [vmem:[#allocation5 + $0x48] sm:$0xf]  ;;  %v1123_v17 = vld [vmem:[#allocation5 + $0x54] sm:$0xf0] }
  0x2a   :  { %292 = vmatpush.bf16.msra.mxu0 %v907_v39  ;;  %v903_v18 = vor.u32 %v1121_v13, %v900_v14  ;;  %v95_v19 = vld [vmem:[#allocation2] sm:$0xf]  ;;  %v899_v20 = vor.u32 %v1123_v17, %v898_v16  ;;  %v1117_v21 = vld [vmem:[#allocation5 + $0x2c] sm:$0xf]  ;;  %v882_v23 = vld [vmem:[#allocation5 + $0x28] sm:$0xf] }
  0x2b   :  { %305 = vmatpush.bf16.msra.mxu1 %v911_v44  ;;  %v884_v22 = vld [vmem:[#allocation5 + $0x38] sm:$0xf0]  ;;  %v1119_v24 = vld [vmem:[#allocation5 + $0x34] sm:$0xf0]  ;;  %v1113_v27 = vld [vmem:[#allocation5 + $0xc] sm:$0xf] }
  0x2c   :  { %v887_v25 = vor.u32 %v1117_v21, %v884_v22  ;;  %v883_v26 = vor.u32 %v1119_v24, %v882_v23  ;;  %v868_v28 = vld [vmem:[#allocation5 + $0x18] sm:$0xf0]  ;;  %v866_v29 = vld [vmem:[#allocation5 + $0x8] sm:$0xf]  ;;  %v1115_v30 = vld [vmem:[#allocation5 + $0x14] sm:$0xf0] }
  0x2d   :  { %330 = vmatpush.bf16.msra.mxu3 %v935_v62  ;;  %317 = vmatpush.bf16.msra.mxu2 %v931_v1  ;;  %v871_v31 = vor.u32 %v1113_v27, %v868_v28  ;;  %v867_v32 = vor.u32 %v1115_v30, %v866_v29  ;;  %v1362_v33 = vmov 8.0   ;;  %v1042_v45 = vld [vmem:[#allocation7 + $0x70] sm:$0xf]  ;;  %v1159_v46 = vld [vmem:[#allocation7 + $0x74] sm:$0xf0]  ;;  %vm404_vm6 = vcmask 1043456  }
  0x2e   :  { %293 = vmatpush.bf16.msra.mxu0 %v891_v51  ;;  %1187 = vrcp.f32 %v1362_v33  ;;  %v1043_v49 = vor.u32 %v1159_v46, %v1042_v45  ;;  %v1106_v50 = vld [vmem:[#allocation7 + $0xf0] sm:$0xf]  ;;  %v1175_v51 = vld [vmem:[#allocation7 + $0xf4] sm:$0xf0]  ;;  %v1158_v54 = vld [vmem:[#allocation7 + $0x74] sm:$0xf] }
  0x2f   :  { %306 = vmatpush.bf16.msra.mxu1 %v895_v56  ;;  %v1107_v53 = vor.u32 %v1175_v51, %v1106_v50  ;;  %v1044_v55 = vld [vmem:[#allocation7 + $0x78] sm:$0xf0]  ;;  %v1174_v56 = vld [vmem:[#allocation7 + $0xf4] sm:$0xf]  ;;  %v1034_v0 = vld [vmem:[#allocation7 + $0x60] sm:$0xf] }
  0x30   :  { %v1047_v59 = vor.u32 %v1158_v54, %v1044_v55  ;;  %v1108_v60 = vld [vmem:[#allocation7 + $0xf8] sm:$0xf0]  ;;  %v1157_v1 = vld [vmem:[#allocation7 + $0x64] sm:$0xf0]  ;;  %v1098_v5 = vld [vmem:[#allocation7 + $0xe0] sm:$0xf] }
  0x31   :  { %331 = vmatpush.bf16.msra.mxu3 %v919_v10  ;;  %318 = vmatpush.bf16.msra.mxu2 %v915_v12  ;;  %v1173_v6 = vld [vmem:[#allocation7 + $0xe4] sm:$0xf0]  ;;  %v1156_v9 = vld [vmem:[#allocation7 + $0x64] sm:$0xf]  ;;  %v1036_v10 = vld [vmem:[#allocation7 + $0x68] sm:$0xf0] }
  0x32   :  { %294 = vmatpush.bf16.msra.mxu0 %v875_v63  ;;  %v1111_v63 = vor.u32 %v1174_v56, %v1108_v60  ;;  %v1099_v8 = vor.u32 %v1173_v6, %v1098_v5  ;;  %v1039_v13 = vor.u32 %v1156_v9, %v1036_v10  ;;  %v1100_v14 = vld [vmem:[#allocation7 + $0xe8] sm:$0xf0]  ;;  %v1026_v17 = vld [vmem:[#allocation7 + $0x50] sm:$0xf]  ;;  %v1171_v22 = vld [vmem:[#allocation7 + $0xd4] sm:$0xf0] }
  0x33   :  { %307 = vmatpush.bf16.msra.mxu1 %v879_v4  ;;  %v1035_v4 = vor.u32 %v1157_v1, %v1034_v0  ;;  %v1154_v23 = vld [vmem:[#allocation7 + $0x54] sm:$0xf]  ;;  %v1028_v24 = vld [vmem:[#allocation7 + $0x58] sm:$0xf0]  ;;  %v1018_v33 = vld [vmem:[#allocation7 + $0x40] sm:$0xf] }
  0x34   :  { %v1188_v34 = vpop.eup %1187  ;;  %v1031_v27 = vor.u32 %v1154_v23, %v1028_v24  ;;  %v1170_v28 = vld [vmem:[#allocation7 + $0xd4] sm:$0xf]  ;;  %v1092_v29 = vld [vmem:[#allocation7 + $0xd8] sm:$0xf0]  ;;  %v1084_v45 = vld [vmem:[#allocation7 + $0xc8] sm:$0xf0] }
  0x35   :  { %332 = vmatpush.bf16.msra.mxu3 %v903_v18  ;;  %319 = vmatpush.bf16.msra.mxu2 %v899_v20  ;;  %v353_v35 = vmul.f32 8.0, %v1188_v34  ;;  %vm357_vm0 = vweird.f32 %v1188_v34  ;;  %v1155_v18 = vld [vmem:[#allocation7 + $0x54] sm:$0xf0]  ;;  %v1074_v51 = vld [vmem:[#allocation7 + $0xb0] sm:$0xf]  ;;  %s1363_s2 = smov [#allocation11]  }
  0x36   :  { %295 = vmatpush.bf16.msra.mxu0 %v859_v11  ;;  %v1172_v11 = vld [vmem:[#allocation7 + $0xe4] sm:$0xf]  ;;  %v1027_v21 = vor.u32 %v1155_v18, %v1026_v17  ;;  %v1151_v50 = vld [vmem:[#allocation7 + $0x34] sm:$0xf0]  ;;  %v1150_v55 = vld [vmem:[#allocation7 + $0x34] sm:$0xf] }
  0x37   :  { %308 = vmatpush.bf16.msra.mxu1 %v863_v15  ;;  %v354_v36 = vsub.f32 1.0, %v353_v35  ;;  %v1103_v16 = vor.u32 %v1172_v11, %v1100_v14  ;;  %v1082_v35 = vld [vmem:[#allocation7 + $0xc0] sm:$0xf]  ;;  %v1167_v54 = vld [vmem:[#allocation7 + $0xb4] sm:$0xf0]  ;;  %s842_s4 = sshll.u32 %s1363_s2, 4  ;;  %s843_s4 = int_to_ptr.vmem [resolvable:$true] %s842_s4 }
  0x38   :  { %v1002_v1 = vld [vmem:[#allocation7 + $0x20] sm:$0xf]  ;;  %v1004_v9 = vld [vmem:[#allocation7 + $0x28] sm:$0xf0]  ;;  %v994_v18 = vld [vmem:[#allocation7 + $0x10] sm:$0xf] }
  0x39   :  { %296 = vmatmul.bf16.vlgmr.msra.gmra.mxu0 %v95_v19  ;;  %333 = vmatpush.bf16.msra.mxu3 %v887_v25  ;;  %v355_v40 = vmul.f32 %v1188_v34, %v354_v36  ;;  %v1068_v14 = vld [vmem:[#allocation7 + $0xa8] sm:$0xf0]  ;;  %v1163_v23 = vld [vmem:[#allocation7 + $0x94] sm:$0xf0]  ;;  %v1146_v24 = vld [vmem:[#allocation7 + $0x14] sm:$0xf] }
  0x3a   :  { %309 = vmatmul.bf16.vlgmr.msra.gmra.mxu1 %v95_v19  ;;  %320 = vmatpush.bf16.msra.mxu2 %v883_v26  ;;  %s844_s21 = sshll.u32 %s1473_s5, 4  ;;  %s845_s21 = int_to_ptr.hbm [resolvable:$true] %s844_s21 }
  0x3b   :  { %v356_v47 = vadd.f32 %v1188_v34, %v355_v40  ;;  %700 = vmatpush.bf16.msrb.mxu0 %v1043_v49  ;;  %713 = vmatpush.bf16.msrb.mxu1 %v1107_v53  ;;  %v1152_v40 = vld [vmem:[#allocation7 + $0x44] sm:$0xf]  ;;  %v1010_v49 = vld [vmem:[#allocation7 + $0x30] sm:$0xf] }
  0x3c   :  { %v1011_v53 = vor.u32 %v1151_v50, %v1010_v49 }
  0x3d   :  { %334 = vmatpush.bf16.msra.mxu3 %v871_v31  ;;  %v1414_v2 = vsel %vm357_vm0, %v1188_v34, %v356_v47  ;;  %v1095_v31 = vor.u32 %v1170_v28, %v1092_v29  ;;  %v1153_v34 = vld [vmem:[#allocation7 + $0x44] sm:$0xf0] }
  0x3e   :  { %321 = vmatpush.bf16.msra.mxu2 %v867_v32 }
  0x3f   :  { %701 = vmatpush.bf16.msrb.mxu0 %v1035_v4  ;;  %714 = vmatpush.bf16.msrb.mxu1 %v1099_v8  ;;  %v1066_v4 = vld [vmem:[#allocation7 + $0xa0] sm:$0xf]  ;;  %v1148_v8 = vld [vmem:[#allocation7 + $0x24] sm:$0xf] }
  0x40   :  { %335 = vmatmul.bf16.vlgmr.msra.gmra.mxu3 %v95_v19 }
  0x41   :  { %322 = vmatmul.bf16.vlgmr.msra.gmra.mxu2 %v95_v19  ;;  %739 = vmatpush.bf16.msrb.mxu3 %v1111_v63  ;;  %v1090_v19 = vld [vmem:[#allocation7 + $0xd0] sm:$0xf] }
  0x42   :  { %726 = vmatpush.bf16.msrb.mxu2 %v1047_v59  ;;  %v1091_v26 = vor.u32 %v1171_v22, %v1090_v19  ;;  %v1166_v59 = vld [vmem:[#allocation7 + $0xb4] sm:$0xf]  ;;  %v1147_v19 = vld [vmem:[#allocation7 + $0x14] sm:$0xf0] }
  0x43   :  { %702 = vmatpush.bf16.msrb.mxu0 %v1027_v21  ;;  %v995_v22 = vor.u32 %v1147_v19, %v994_v18 }
  0x44   :  { %715 = vmatpush.bf16.msrb.mxu1 %v1091_v26  ;;  %v996_v26 = vld [vmem:[#allocation7 + $0x18] sm:$0xf0] }
  0x45   :  { %740 = vmatpush.bf16.msrb.mxu3 %v1103_v16  ;;  %v999_v29 = vor.u32 %v1146_v24, %v996_v26 }
  0x46   :  { %727 = vmatpush.bf16.msrb.mxu2 %v1039_v13  ;;  %v1164_v13 = vld [vmem:[#allocation7 + $0xa4] sm:$0xf] }
  0x47   :  { %v1071_v16 = vor.u32 %v1164_v13, %v1068_v14 }
  0x49   :  { %741 = vmatpush.bf16.msrb.mxu3 %v1095_v31  ;;  %v1162_v31 = vld [vmem:[#allocation7 + $0x94] sm:$0xf] }
  0x4a   :  { %728 = vmatpush.bf16.msrb.mxu2 %v1031_v27 }
  0xb6   :  { %v297_v37 = vpop.f32.mrf.mxu0 }
  0xb7   :  { %v340_v38 = vrot.slane %v297_v37, 4  ;;  %v1409_v39 = vpop.f32.mrf.mxu1 }
  0xb8   :  { %v346_v41 = vrot.slane %v1409_v39, 4 }
  0xb9   :  { %v341_v42 = vadd.f32 %v340_v38, %v297_v37  ;;  %v1169_v38 = vld [vmem:[#allocation7 + $0xc4] sm:$0xf0] }
  0xba   :  { %v347_v43 = vadd.f32 %v346_v41, %v1409_v39  ;;  %v1020_v41 = vld [vmem:[#allocation7 + $0x48] sm:$0xf0] }
  0xbb   :  { %v342_v44 = vrot.slane %v341_v42, 2 }
  0xbc   :  { %v348_v48 = vrot.slane %v347_v43, 2 }
  0xbd   :  { %v343_v52 = vadd.f32 %v342_v44, %v341_v42  ;;  %v1168_v44 = vld [vmem:[#allocation7 + $0xc4] sm:$0xf] }
  0xbe   :  { %v349_v57 = vadd.f32 %v348_v48, %v347_v43  ;;  %v299_v58 = vpop.f32.mrf.mxu0  ;;  %v1023_v43 = vor.u32 %v1152_v40, %v1020_v41  ;;  %v1087_v47 = vor.u32 %v1168_v44, %v1084_v45 }
  0xbf   :  { %v344_v61 = vrot.slane %v343_v52, 1  ;;  %v312_v62 = vpop.f32.mrf.mxu1  ;;  %v1012_v58 = vld [vmem:[#allocation7 + $0x38] sm:$0xf0] }
  0xc0   :  { %v350_v3 = vrot.slane %v349_v57, 1  ;;  %729 = vmatpush.bf16.msrb.mxu2 %v1023_v43  ;;  %742 = vmatpush.bf16.msrb.mxu3 %v1087_v47  ;;  %v1076_v62 = vld [vmem:[#allocation7 + $0xb8] sm:$0xf0]  ;;  %v988_v43 = vld [vmem:[#allocation7 + $0x8] sm:$0xf0] }
  0xc1   :  { %v345_v7 = vadd.f32 %v344_v61, %v343_v52  ;;  %v1015_v61 = vor.u32 %v1150_v55, %v1012_v58  ;;  %v1079_v0 = vor.u32 %v1166_v59, %v1076_v62  ;;  %v1052_v47 = vld [vmem:[#allocation7 + $0x88] sm:$0xf0] }
  0xc2   :  { %v351_v12 = vadd.f32 %v350_v3, %v349_v57  ;;  %v1075_v57 = vor.u32 %v1167_v54, %v1074_v51  ;;  %v1149_v3 = vld [vmem:[#allocation7 + $0x24] sm:$0xf0] }
  0xc3   :  { %v359_v15 = vmul.f32 %v1414_v2, %v345_v7  ;;  %v1003_v6 = vor.u32 %v1149_v3, %v1002_v1  ;;  %v1165_v7 = vld [vmem:[#allocation7 + $0xa4] sm:$0xf0]  ;;  %v336_v49 = vpop.f32.mrf.mxu3 }
  0xc4   :  { %v360_v20 = vmul.f32 %v1414_v2, %v351_v12  ;;  %730 = vmatpush.bf16.msrb.mxu2 %v1015_v61  ;;  %743 = vmatpush.bf16.msrb.mxu3 %v1079_v0  ;;  %v1067_v11 = vor.u32 %v1165_v7, %v1066_v4  ;;  %v1007_v12 = vor.u32 %v1148_v8, %v1004_v9  ;;  %v434_v51 = vrot.slane %v336_v49, 4  ;;  %v1430_v8 = vld [vmem:[#allocation8] sm:$0xff] }
  0xc5   :  { %v1418_v25 = vsub.f32 %v297_v37, %v359_v15  ;;  %v1019_v37 = vor.u32 %v1153_v34, %v1018_v33  ;;  %v986_v33 = vld [vmem:[#allocation7] sm:$0xf]  ;;  %v418_v13 = vperm.slane %v1430_v8, 1  ;;  %v419_v14 = vperm.slane %v1430_v8, 5 }
  0xc6   :  { %v1421_v30 = vsub.f32 %v1409_v39, %v360_v20  ;;  %v1083_v39 = vor.u32 %v1169_v38, %v1082_v35  ;;  %v1058_v20 = vld [vmem:[#allocation7 + $0x90] sm:$0xf]  ;;  %v1161_v38 = vld [vmem:[#allocation7 + $0x84] sm:$0xf0]  ;;  %v435_v55 = vadd.f32 %v434_v51, %v336_v49 }
  0xc7   :  { %v363_v32 = vmul.f32 %v1418_v25, %v1418_v25  ;;  %703 = vmatpush.bf16.msrb.mxu0 %v1019_v37  ;;  %v1059_v28 = vor.u32 %v1163_v23, %v1058_v20  ;;  %v1050_v37 = vld [vmem:[#allocation7 + $0x80] sm:$0xf]  ;;  %v422_v23 = vperm.slane %v418_v13, 1  ;;  %v423_v24 = vperm.slane %v419_v14, 1 }
  0xc8   :  { %v364_v36 = vmul.f32 %v1421_v30, %v1421_v30  ;;  %716 = vmatpush.bf16.msrb.mxu1 %v1083_v39  ;;  %731 = vmatpush.bf16.msrb.mxu2 %v1007_v12  ;;  %v1144_v39 = vld [vmem:[#allocation7 + $0x4] sm:$0xf]  ;;  %v436_v58 = vrot.slane %v435_v55, 2 }
  0xc9   :  { %v365_v42 = vrot.slane %v363_v32, 4  ;;  %744 = vmatpush.bf16.msrb.mxu3 %v1071_v16  ;;  %v991_v45 = vor.u32 %v1144_v39, %v988_v43 }
  0xca   :  { %v371_v46 = vrot.slane %v364_v36, 4  ;;  %v437_v61 = vadd.f32 %v436_v58, %v435_v55 }
  0xcb   :  { %v366_v48 = vadd.f32 %v365_v42, %v363_v32  ;;  %704 = vmatpush.bf16.msrb.mxu0 %v1011_v53  ;;  %v1060_v32 = vld [vmem:[#allocation7 + $0x98] sm:$0xf0]  ;;  %v1051_v42 = vor.u32 %v1161_v38, %v1050_v37 }
  0xcc   :  { %v372_v52 = vadd.f32 %v371_v46, %v364_v36  ;;  %717 = vmatpush.bf16.msrb.mxu1 %v1075_v57  ;;  %v1063_v35 = vor.u32 %v1162_v31, %v1060_v32  ;;  %v1145_v36 = vld [vmem:[#allocation7 + $0x4] sm:$0xf0]  ;;  %732 = vmatpush.bf16.msrb.mxu2 %v999_v29  ;;  %v1160_v46 = vld [vmem:[#allocation7 + $0x84] sm:$0xf]  ;;  %v438_v1 = vrot.slane %v437_v61, 1 }
  0xcd   :  { %v367_v56 = vrot.slane %v366_v48, 2  ;;  %v987_v41 = vor.u32 %v1145_v36, %v986_v33 }
  0xce   :  { %v373_v60 = vrot.slane %v372_v52, 2  ;;  %745 = vmatpush.bf16.msrb.mxu3 %v1063_v35 }
  0xcf   :  { %v368_v63 = vadd.f32 %v367_v56, %v366_v48  ;;  %705 = vmatpush.bf16.msrb.mxu0 %v1003_v6  ;;  %v1055_v48 = vor.u32 %v1160_v46, %v1052_v47 }
  0xd0   :  { %v374_v5 = vadd.f32 %v373_v60, %v372_v52  ;;  %718 = vmatpush.bf16.msrb.mxu1 %v1067_v11  ;;  %733 = vmatpush.bf16.msrb.mxu2 %v991_v45 }
  0xd1   :  { %v369_v10 = vrot.slane %v368_v63, 1 }
  0xd2   :  { %v375_v15 = vrot.slane %v374_v5, 1  ;;  %746 = vmatpush.bf16.msrb.mxu3 %v1055_v48 }
  0xd3   :  { %v370_v17 = vadd.f32 %v369_v10, %v368_v63  ;;  %706 = vmatpush.bf16.msrb.mxu0 %v995_v22  ;;  %v338_v63 = vpop.f32.mrf.mxu3 }
  0xd4   :  { %v376_v21 = vadd.f32 %v375_v15, %v374_v5  ;;  %719 = vmatpush.bf16.msrb.mxu1 %v1059_v28  ;;  %v439_v5 = vadd.f32 %v438_v1, %v437_v61  ;;  %v323_v15 = vpop.f32.mrf.mxu2 }
  0xd5   :  { %v377_v27 = vmul.f32 %v370_v17, %v1414_v2  ;;  %v428_v18 = vrot.slane %v323_v15, 4 }
  0xd6   :  { %v378_v34 = vmul.f32 %v376_v21, %v1414_v2  ;;  %v441_v7 = vmul.f32 %v439_v5, %v1414_v2 }
  0xd7   :  { %v379_v40 = vadd.f32 1e-05, %v377_v27  ;;  %707 = vmatpush.bf16.msrb.mxu0 %v987_v41  ;;  %v429_v22 = vadd.f32 %v428_v18, %v323_v15 }
  0xd8   :  { %v380_v44 = vadd.f32 1e-05, %v378_v34  ;;  %720 = vmatpush.bf16.msrb.mxu1 %v1051_v42  ;;  %v1432_v11 = vsub.f32 %v336_v49, %v441_v7 }
  0xd9   :  { %1189 = vrsqrt.f32 %v379_v40  ;;  %vm387_vm5 = vweird.f32 %v379_v40  ;;  %v430_v29 = vrot.slane %v429_v22, 2 }
  0xda   :  { %1191 = vrsqrt.f32 %v380_v44  ;;  %vm397_vm2 = vweird.f32 %v380_v44  ;;  %v445_v17 = vmul.f32 %v1432_v11, %v1432_v11 }
  0xdb   :  { %v431_v34 = vadd.f32 %v430_v29, %v429_v22 }
  0xdc   :  { %v452_v21 = vrot.slane %v445_v17, 4  ;;  %v325_v35 = vpop.f32.mrf.mxu2 }
  0xde   :  { %v453_v28 = vadd.f32 %v452_v21, %v445_v17 }
  0xdf   :  { %v1190_v50 = vpop.eup %1189 }
  0xe0   :  { %v1192_v52 = vpop.eup %1191  ;;  %v382_v53 = vmul.f32 %v1190_v50, %v379_v40  ;;  %vm388_vm3 = vweird.f32 %v1190_v50  ;;  %v454_v33 = vrot.slane %v453_v28, 2  ;;  %v432_v40 = vrot.slane %v431_v34, 1 }
  0xe1   :  { %v392_v54 = vmul.f32 %v1192_v52, %v380_v44  ;;  %vm398_vm1 = vweird.f32 %v1192_v52  ;;  %vm389_vm7 = vmor %vm387_vm5, %vm388_vm3  ;;  %vm809_vm3 = vcmask 1041408  }
  0xe2   :  { %v383_v56 = vmul.f32 %v1190_v50, %v382_v53  ;;  %vm399_vm4 = vmor %vm397_vm2, %vm398_vm1  ;;  %v455_v38 = vadd.f32 %v454_v33, %v453_v28  ;;  %v433_v43 = vadd.f32 %v432_v40, %v431_v34 }
  0xe3   :  { %v393_v57 = vmul.f32 %v1192_v52, %v392_v54 }
  0xe4   :  { %v384_v59 = vmul.f32 0.5, %v383_v56  ;;  %v456_v39 = vrot.slane %v455_v38, 1  ;;  %v440_v47 = vmul.f32 %v433_v43, %v1414_v2 }
  0xe5   :  { %v394_v60 = vmul.f32 0.5, %v393_v57 }
  0xe6   :  { %v385_v62 = vsub.f32 1.5, %v384_v59  ;;  %v457_v46 = vadd.f32 %v456_v39, %v455_v38 }
  0xe7   :  { %v395_v0 = vsub.f32 1.5, %v394_v60 }
  0xe8   :  { %v386_v3 = vmul.f32 %v1190_v50, %v385_v62 }
  0xe9   :  { %v396_v4 = vmul.f32 %v1192_v52, %v395_v0 }
  0xea   :  { %v390_v10 = vsel %vm389_vm7, %v1190_v50, %v386_v3 }
  0xeb   :  { %v400_v6 = vsel %vm399_vm4, %v1192_v52, %v396_v4 }
  0xec   :  { %v403_v9 = vrot.slane %v400_v6, 4 }
  0xee   :  { %v405_v12 = vsel %vm404_vm6, %v390_v10, %v403_v9 }
  0xef   :  { %v407_v16 = vmul.f32 %v405_v12, %v1430_v8 }
  0xf1   :  { %v410_v19 = vperm.slane %v407_v16, 4  ;;  %v409_v20 = vperm.slane %v407_v16, 0 }
  0xf3   :  { %v414_v26 = vperm.slane %v410_v19, 0  ;;  %v413_v27 = vperm.slane %v409_v20, 0 }
  0xf5   :  { %v416_v31 = vmul.f32 %v414_v26, %v1421_v30  ;;  %v415_v32 = vmul.f32 %v413_v27, %v1418_v25  ;;  %v459_v25 = vmul.f32 %v457_v46, %v1414_v2  ;;  %v442_v30 = vsub.f32 %v323_v15, %v440_v47 }
  0xf7   :  { %v424_v36 = vadd.f32 %v422_v23, %v415_v32  ;;  %v425_v37 = vadd.f32 %v423_v24, %v416_v31  ;;  %v461_v48 = vadd.f32 1e-05, %v459_v25  ;;  %v444_v49 = vmul.f32 %v442_v30, %v442_v30 }
  0xf9   :  { %v426_v41 = vmax.f32 %v424_v36, 0.0  ;;  %v427_v42 = vmax.f32 %v425_v37, 0.0  ;;  %1193 = vrsqrt.f32 %v461_v48  ;;  %v446_v50 = vrot.slane %v444_v49, 4 }
  0xfa   :  { %vm478_vm8 = vweird.f32 %v461_v48 }
  0xfb   :  { %v506_v44 = vpack.c.bf16 %v426_v41, %v426_v41  ;;  %v507_v45 = vpack.c.bf16 %v427_v42, %v427_v42  ;;  %v447_v51 = vadd.f32 %v446_v50, %v444_v49 }
  0xfd   :  { %708 = vmatmul.bf16.vlgmr.msrb.gmra.mxu0 %v506_v44  ;;  %721 = vmatmul.bf16.vlgmr.msrb.gmra.mxu1 %v507_v45  ;;  %v448_v52 = vrot.slane %v447_v51, 2 }
  0xfe   :  { %734 = vmatmul.bf16.vlgmr.msrb.gmra.mxu2 %v506_v44  ;;  %747 = vmatmul.bf16.vlgmr.msrb.gmra.mxu3 %v507_v45 }
  0xff   :  { %v1194_v53 = vpop.eup %1193  ;;  %v449_v54 = vadd.f32 %v448_v52, %v447_v51 }
 0x100   :  { %v473_v55 = vmul.f32 %v1194_v53, %v461_v48  ;;  %vm479_vm9 = vweird.f32 %v1194_v53 }
 0x101   :  { %v450_v56 = vrot.slane %v449_v54, 1  ;;  %vm480_vm10 = vmor %vm478_vm8, %vm479_vm9 }
 0x102   :  { %v474_v58 = vmul.f32 %v1194_v53, %v473_v55 }
 0x103   :  { %v451_v57 = vadd.f32 %v450_v56, %v449_v54 }
 0x104   :  { %v475_v61 = vmul.f32 0.5, %v474_v58 }
 0x105   :  { %v458_v59 = vmul.f32 %v451_v57, %v1414_v2 }
 0x106   :  { %v476_v62 = vsub.f32 1.5, %v475_v61 }
 0x107   :  { %v460_v60 = vadd.f32 1e-05, %v458_v59 }
 0x108   :  { %v477_v1 = vmul.f32 %v1194_v53, %v476_v62 }
 0x109   :  { %1195 = vrsqrt.f32 %v460_v60  ;;  %vm468_vm11 = vweird.f32 %v460_v60 }
 0x10a   :  { %v481_v5 = vsel %vm480_vm10, %v1194_v53, %v477_v1 }
 0x10b   :  { %v484_v7 = vrot.slane %v481_v5, 4 }
 0x10f   :  { %v1196_v63 = vpop.eup %1195 }
 0x110   :  { %v463_v0 = vmul.f32 %v1196_v63, %v460_v60  ;;  %vm469_vm12 = vweird.f32 %v1196_v63 }
 0x111   :  { %vm470_vm13 = vmor %vm468_vm11, %vm469_vm12 }
 0x112   :  { %v464_v3 = vmul.f32 %v1196_v63, %v463_v0 }
 0x114   :  { %v465_v4 = vmul.f32 0.5, %v464_v3 }
 0x116   :  { %v466_v6 = vsub.f32 1.5, %v465_v4 }
 0x118   :  { %v467_v9 = vmul.f32 %v1196_v63, %v466_v6 }
 0x11a   :  { %v471_v10 = vsel %vm470_vm13, %v1196_v63, %v467_v9 }
 0x11b   :  { %v485_v12 = vsel %vm404_vm6, %v471_v10, %v484_v7 }
 0x11c   :  { %v486_v13 = vrot.slane %v485_v12, 6 }
 0x11e   :  { %v488_v14 = vmul.f32 %v486_v13, %v1430_v8 }
 0x120   :  { %v490_v15 = vperm.slane %v488_v14, 2  ;;  %v491_v18 = vperm.slane %v488_v14, 6 }
 0x122   :  { %v494_v16 = vperm.slane %v490_v15, 2  ;;  %v495_v19 = vperm.slane %v491_v18, 2  ;;  %v94_v15 = vld [vmem:[#allocation10] sm:$0xf] }
 0x124   :  { %v1447_v17 = vmul.f32 %v494_v16, %v442_v30  ;;  %v1450_v20 = vmul.f32 %v495_v19, %v1432_v11  ;;  %v498_v19 = vperm.slane %v1430_v8, 3 }
 0x17a   :  { %v709_v21 = vpop.f32.mrf.mxu0  ;;  %v722_v22 = vpop.f32.mrf.mxu1 }
 0x17b   :  { %v723_v23 = vadd.f32 %v722_v22, %v709_v21  ;;  %v499_v22 = vperm.slane %v1430_v8, 7 }
 0x17d   :  { %v752_v24 = vrot.slane %v723_v23, 4 }
 0x17f   :  { %v753_v26 = vadd.f32 %v752_v24, %v723_v23  ;;  %v824_v24 = vperm.slane %v94_v15, 3 }
 0x181   :  { %v754_v27 = vrot.slane %v753_v26, 2  ;;  %v735_v28 = vpop.f32.mrf.mxu2  ;;  %v748_v29 = vpop.f32.mrf.mxu3 }
 0x182   :  { %v749_v31 = vadd.f32 %v748_v29, %v735_v28  ;;  %v711_v32 = vpop.f32.mrf.mxu0  ;;  %v724_v33 = vpop.f32.mrf.mxu1  ;;  %v502_v29 = vperm.slane %v498_v19, 3 }
 0x183   :  { %v755_v34 = vadd.f32 %v754_v27, %v753_v26  ;;  %v823_v26 = vperm.slane %v94_v15, 1 }
 0x184   :  { %v758_v35 = vrot.slane %v749_v31, 4 }
 0x185   :  { %v756_v36 = vrot.slane %v755_v34, 1 }
 0x186   :  { %v759_v37 = vadd.f32 %v758_v35, %v749_v31  ;;  %v827_v35 = vperm.slane %v823_v26, 1 }
 0x187   :  { %v757_v38 = vadd.f32 %v756_v36, %v755_v34  ;;  %v828_v34 = vperm.slane %v824_v24, 1 }
 0x188   :  { %v760_v40 = vrot.slane %v759_v37, 2 }
 0x189   :  { %v764_v11 = vmul.f32 %v757_v38, %v1414_v2  ;;  %v737_v41 = vpop.f32.mrf.mxu2  ;;  %v750_v42 = vpop.f32.mrf.mxu3  ;;  %v504_v38 = vadd.f32 %v502_v29, %v1447_v17 }
 0x18a   :  { %v761_v39 = vadd.f32 %v760_v40, %v759_v37 }
 0x18b   :  { %v1453_v43 = vsub.f32 %v723_v23, %v764_v11 }
 0x18c   :  { %v762_v44 = vrot.slane %v761_v39, 1 }
 0x18d   :  { %v768_v45 = vmul.f32 %v1453_v43, %v1453_v43 }
 0x18e   :  { %v763_v46 = vadd.f32 %v762_v44, %v761_v39 }
 0x18f   :  { %v770_v47 = vrot.slane %v768_v45, 4 }
 0x190   :  { %v765_v25 = vmul.f32 %v763_v46, %v1414_v2 }
 0x191   :  { %v771_v30 = vadd.f32 %v770_v47, %v768_v45 }
 0x192   :  { %v767_v48 = vsub.f32 %v749_v31, %v765_v25  ;;  %v503_v31 = vperm.slane %v499_v22, 3 }
 0x193   :  { %v772_v49 = vrot.slane %v771_v30, 2 }
 0x194   :  { %v769_v50 = vmul.f32 %v767_v48, %v767_v48  ;;  %v505_v11 = vadd.f32 %v503_v31, %v1450_v20 }
 0x195   :  { %v773_v51 = vadd.f32 %v772_v49, %v771_v30 }
 0x196   :  { %v776_v52 = vrot.slane %v769_v50, 4 }
 0x197   :  { %v774_v53 = vrot.slane %v773_v51, 1 }
 0x198   :  { %v777_v54 = vadd.f32 %v776_v52, %v769_v50 }
 0x199   :  { %v775_v55 = vadd.f32 %v774_v53, %v773_v51 }
 0x19a   :  { %v778_v56 = vrot.slane %v777_v54, 2 }
 0x19b   :  { %v782_v57 = vmul.f32 %v775_v55, %v1414_v2 }
 0x19c   :  { %v779_v58 = vadd.f32 %v778_v56, %v777_v54 }
 0x19d   :  { %v784_v59 = vadd.f32 1e-05, %v782_v57 }
 0x19e   :  { %v780_v60 = vrot.slane %v779_v58, 1 }
 0x19f   :  { %1197 = vrsqrt.f32 %v784_v59  ;;  %vm792_vm2 = vweird.f32 %v784_v59 }
 0x1a0   :  { %v781_v61 = vadd.f32 %v780_v60, %v779_v58 }
 0x1a2   :  { %v783_v62 = vmul.f32 %v781_v61, %v1414_v2 }
 0x1a4   :  { %v785_v63 = vadd.f32 1e-05, %v783_v62 }
 0x1a5   :  { %v1198_v0 = vpop.eup %1197 }
 0x1a6   :  { %v787_v1 = vmul.f32 %v1198_v0, %v784_v59  ;;  %1199 = vrsqrt.f32 %v785_v63  ;;  %vm793_vm15 = vweird.f32 %v1198_v0  ;;  %vm802_vm0 = vweird.f32 %v785_v63 }
 0x1a7   :  { %vm794_vm4 = vmor %vm792_vm2, %vm793_vm15 }
 0x1a8   :  { %v788_v3 = vmul.f32 %v1198_v0, %v787_v1 }
 0x1aa   :  { %v789_v5 = vmul.f32 0.5, %v788_v3 }
 0x1ac   :  { %v1200_v4 = vpop.eup %1199  ;;  %v790_v9 = vsub.f32 1.5, %v789_v5 }
 0x1ad   :  { %v797_v6 = vmul.f32 %v1200_v4, %v785_v63  ;;  %vm803_vm14 = vweird.f32 %v1200_v4 }
 0x1ae   :  { %v791_v13 = vmul.f32 %v1198_v0, %v790_v9  ;;  %vm804_vm1 = vmor %vm802_vm0, %vm803_vm14 }
 0x1af   :  { %v798_v7 = vmul.f32 %v1200_v4, %v797_v6 }
 0x1b0   :  { %v795_v18 = vsel %vm794_vm4, %v1198_v0, %v791_v13 }
 0x1b1   :  { %v799_v10 = vmul.f32 0.5, %v798_v7 }
 0x1b3   :  { %v800_v12 = vsub.f32 1.5, %v799_v10 }
 0x1b5   :  { %v801_v14 = vmul.f32 %v1200_v4, %v800_v12 }
 0x1b7   :  { %v805_v2 = vsel %vm804_vm1, %v1200_v4, %v801_v14 }
 0x1b8   :  { %v808_v16 = vrot.slane %v805_v2, 6 }
 0x1ba   :  { %v810_v21 = vsel %vm809_vm3, %v795_v18, %v808_v16 }
 0x1bb   :  { %v812_v23 = vmul.f32 %v810_v21, %v94_v15 }
 0x1bd   :  { %v814_v27 = vperm.slane %v812_v23, 0  ;;  %v815_v28 = vperm.slane %v812_v23, 2 }
 0x1bf   :  { %v818_v32 = vperm.slane %v814_v27, 0  ;;  %v819_v33 = vperm.slane %v815_v28, 0 }
 0x1c1   :  { %v821_v36 = vmul.f32 %v819_v33, %v767_v48  ;;  %v820_v37 = vmul.f32 %v818_v32, %v1453_v43 }
 0x1c3   :  { %v830_v40 = vadd.f32 %v828_v34, %v821_v36  ;;  %v829_v8 = vadd.f32 %v827_v35, %v820_v37 }
 0x1c5   :  { %v831_v41 = vadd.f32 %v829_v8, %v504_v38  ;;  %v832_v42 = vadd.f32 %v830_v40, %v505_v11 }
 0x1c7   :  { %v833_v39 = vmax.f32 %v831_v41, 0.0  ;;  %v834_v44 = vmax.f32 %v832_v42, 0.0 }
 0x1c9   :  { %835 = vst [vmem:[#allocation11] sm:$0xff] %v833_v39 }
 0x1ca   :  { %836 = vst [vmem:[#allocation11 + $0x8] sm:$0xff] %v834_v44 }
 0x1cb   :  { %847 = dma.vmem_to_hbm [thread:$0]  %s843_s4, 256, %s845_s21, [#allocation4]  }
 0x1cc   :  { %1351 = dma.done.wait [#allocation4], 256  }
 0x1cd   :  { %1352 = vsyncadd [#allocation4], 4294967040 }
 0x1ce   :  { %852 = vsyncpa [#allocation3], 1 }
 0x1cf   :  { %853 = vsyncpa [#allocation6], 1 }
 0x1d0   :  { %854 = vsyncpa [#allocation9], 1 }
 0x1d1   :  { %855 = vsyncpa [#allocation4], 1 }

</bundles_post_ra>
